<compile_context>
chip_gen: v6e
topology: v6e:2x2x1
jax: 0.10.0
libtpu: 0.0.40
codegen_flags: <defaults>
</compile_context>

<pallas_src>
import jax
import jax.numpy as jnp
from jax.experimental import pallas as pl
from jax.experimental.pallas import tpu as pltpu  # noqa: F401  (not needed for this grid-less call)


# ----------------------------------------------------------------------------
# Pallas kernel: fused feature contraction + EMOS head (single invocation)
# ----------------------------------------------------------------------------

def _emos_kernel(f_ref, w_ref, mu_ref, sig_ref, mu_out_ref, std_out_ref):
    """f_ref:   (B*T, I*S)   features, rows ordered (b, t), lanes ordered (i, s)
       w_ref:   (4,   T, I*S) matrix coefficients m = 0..3, layout [m, t, i*S+s]
       mu_ref:  (B*T, S)      prior mean
       sig_ref: (B*T, S)      prior std (> 0)
       mu_out_ref / std_out_ref: (B*T, S)"""
    BT, IS = f_ref.shape
    n_coeff, T, _ = w_ref.shape
    S = mu_ref.shape[-1]
    I = IS // S
    B = BT // T

    # Weight slabs (T, S), shared across the batch -> hoisted once and reused.
    w = [[w_ref[m, :, pl.ds(i * S, S)] for i in range(I)] for m in range(n_coeff)]

    # Statically unrolled batch loop (B is tiny here).  Every slab below is a
    # vreg-aligned (T, S) = (8, 256) tile at aligned sublane/lane offsets.
    # For large B, tile over the fused (B*T) row axis with a grid instead.
    for b in range(B):
        rows = pl.ds(b * T, T)
        # Hoist the I feature slabs once; reused by all four theta(m).
        f = [f_ref[rows, pl.ds(i * S, S)] for i in range(I)]

        def theta(m):
            # theta_m[t, s] = sum_i features[b, t, i, s] * matrix[t, m, i, s]
            acc = f[0] * w[m][0]
            for i in range(1, I):
                acc = acc + f[i] * w[m][i]
            return acc

        t0, t1, t2, t3 = theta(0), theta(1), theta(2), theta(3)
        # NOTE: theta_rolled in the PyTorch forward is computed but never used;
        # it does not influence the returned distribution, so it is skipped.
        mu_out_ref[rows, :] = mu_ref[rows, :] * t0 + t1
        std_out_ref[rows, :] = jnp.exp(sig_ref[rows, :] * t2 + t3)


# ----------------------------------------------------------------------------
# Parameter prep (one-time, OUTSIDE the jitted forward) + forward wrapper
# ----------------------------------------------------------------------------

def prepare_matrix(matrix):
    """One-time layout prep of the module parameter (not per-call data).

    (T, out_dim, I, J, K) -> (4, T, I*J*K) float32, keeping only the four
    coefficients the forward actually uses (m = 0..3)."""
    T, M, I, J, K = matrix.shape
    assert M >= 4, "forward uses theta coefficients 0..3"
    w = jnp.transpose(matrix[:, :4], (1, 0, 2, 3, 4))          # (4, T, I, J, K)
    return jnp.asarray(w, jnp.float32).reshape(4, T, I * J * K)


def spatiotemporal_emos_forward(matrix_prepped, mu, sigma, features, truth=None):
    """matrix_prepped: (4, T, I*J*K)  from prepare_matrix(matrix)
       mu, sigma:      (B, T, J, K)   (sigma > 0)
       features:       (B, T, I, J, K)
       truth:          unused by the reference forward (ignored)
       returns (mu_pred, sigma_pred), each (B, T, J, K) -- the parameters of the
       Normal distribution the PyTorch module returns."""
    del truth  # unused by the reference forward
    B, T, I, J, K = features.shape
    assert matrix_prepped.shape[1] == T
    S = J * K
    BT = B * T

    # Free, contiguous reshapes only -- no transposes, no copies in the forward.
    f = features.reshape(BT, I * S)
    mu_f = mu.reshape(BT, S)
    sg_f = sigma.reshape(BT, S)

    mu_pred, sigma_pred = pl.pallas_call(
        _emos_kernel,
        out_shape=(jax.ShapeDtypeStruct((BT, S), jnp.float32),
                   jax.ShapeDtypeStruct((BT, S), jnp.float32)),
        # Single invocation, no grid: every operand sits whole in VMEM
        # (< 0.5 MiB total) and per-step pipeline overhead is paid exactly once.
    )(f, matrix_prepped, mu_f, sg_f)

    return mu_pred.reshape(B, T, J, K), sigma_pred.reshape(B, T, J, K)


# ----------------------------------------------------------------------------
# Main
# ----------------------------------------------------------------------------

if __name__ == "__main__":
    B, T, I, J, K, M = 2, 8, 4, 16, 16, 4   # batch, time, feature, lat, lon, out

    key = jax.random.PRNGKey(0)
    k_mat, k_feat, k_mu, k_sig, k_truth = jax.random.split(key, 5)

    matrix = jax.random.normal(k_mat, (T, M, I, J, K), jnp.float32)
    features = jax.random.normal(k_feat, (B, T, I, J, K), jnp.float32)
    mu = jax.random.normal(k_mu, (B, T, J, K), jnp.float32)
    sigma = 0.5 + jax.random.uniform(k_sig, (B, T, J, K), jnp.float32)   # > 0
    truth = jax.random.normal(k_truth, (B, T, J, K), jnp.float32)        # unused

    # Parameter layout prep happens ONCE, outside the jitted forward.
    matrix_prepped = jax.block_until_ready(prepare_matrix(matrix))

    fwd = jax.jit(spatiotemporal_emos_forward)
    mu_pred, sigma_pred = fwd(matrix_prepped, mu, sigma, features, truth)
    jax.block_until_ready((mu_pred, sigma_pred))

    # Pure-JAX reference for correctness.
    theta = jnp.einsum('btijk,tmijk->btmjk', features, matrix)
    mu_ref = mu * theta[:, :, 0] + theta[:, :, 1]
    sg_ref = jnp.exp(sigma * theta[:, :, 2] + theta[:, :, 3])

    assert mu_pred.shape == (B, T, J, K) and sigma_pred.shape == (B, T, J, K)
    assert bool(jnp.all(sigma_pred > 0.0))
    assert bool(jnp.allclose(mu_pred, mu_ref, rtol=1e-4, atol=1e-5))
    assert bool(jnp.allclose(sigma_pred, sg_ref, rtol=1e-4, atol=1e-5))
    print("KERNEL_OK")
</pallas_src>

<mosaic_0001>
module attributes {stable_mosaic.version = 11 : i64} {
  func.func @_emos_kernel(%arg0: memref<16x1024xf32, #tpu.memory_space<vmem>>, %arg1: memref<4x8x1024xf32, #tpu.memory_space<vmem>>, %arg2: memref<16x256xf32, #tpu.memory_space<vmem>>, %arg3: memref<16x256xf32, #tpu.memory_space<vmem>>, %arg4: memref<16x256xf32, #tpu.memory_space<vmem>>, %arg5: memref<16x256xf32, #tpu.memory_space<vmem>>) attributes {dimension_semantics = [], scalar_prefetch = 0 : i64, scratch_operands = 0 : i64, tpu.core_type = #tpu.core_type<tc>} {
    %c0 = arith.constant 0 : index
    %c0_0 = arith.constant 0 : index
    %c0_1 = arith.constant 0 : index
    %0 = vector.load %arg1[%c0, %c0_0, %c0_1] : memref<4x8x1024xf32, #tpu.memory_space<vmem>>, vector<1x8x256xf32>
    %1 = vector.shape_cast %0 : vector<1x8x256xf32> to vector<8x256xf32>
    %c0_2 = arith.constant 0 : index
    %c0_3 = arith.constant 0 : index
    %c256 = arith.constant 256 : index
    %2 = vector.load %arg1[%c0_2, %c0_3, %c256] : memref<4x8x1024xf32, #tpu.memory_space<vmem>>, vector<1x8x256xf32>
    %3 = vector.shape_cast %2 : vector<1x8x256xf32> to vector<8x256xf32>
    %c0_4 = arith.constant 0 : index
    %c0_5 = arith.constant 0 : index
    %c512 = arith.constant 512 : index
    %4 = vector.load %arg1[%c0_4, %c0_5, %c512] : memref<4x8x1024xf32, #tpu.memory_space<vmem>>, vector<1x8x256xf32>
    %5 = vector.shape_cast %4 : vector<1x8x256xf32> to vector<8x256xf32>
    %c0_6 = arith.constant 0 : index
    %c0_7 = arith.constant 0 : index
    %c768 = arith.constant 768 : index
    %6 = vector.load %arg1[%c0_6, %c0_7, %c768] : memref<4x8x1024xf32, #tpu.memory_space<vmem>>, vector<1x8x256xf32>
    %7 = vector.shape_cast %6 : vector<1x8x256xf32> to vector<8x256xf32>
    %c1 = arith.constant 1 : index
    %c0_8 = arith.constant 0 : index
    %c0_9 = arith.constant 0 : index
    %8 = vector.load %arg1[%c1, %c0_8, %c0_9] : memref<4x8x1024xf32, #tpu.memory_space<vmem>>, vector<1x8x256xf32>
    %9 = vector.shape_cast %8 : vector<1x8x256xf32> to vector<8x256xf32>
    %c1_10 = arith.constant 1 : index
    %c0_11 = arith.constant 0 : index
    %c256_12 = arith.constant 256 : index
    %10 = vector.load %arg1[%c1_10, %c0_11, %c256_12] : memref<4x8x1024xf32, #tpu.memory_space<vmem>>, vector<1x8x256xf32>
    %11 = vector.shape_cast %10 : vector<1x8x256xf32> to vector<8x256xf32>
    %c1_13 = arith.constant 1 : index
    %c0_14 = arith.constant 0 : index
    %c512_15 = arith.constant 512 : index
    %12 = vector.load %arg1[%c1_13, %c0_14, %c512_15] : memref<4x8x1024xf32, #tpu.memory_space<vmem>>, vector<1x8x256xf32>
    %13 = vector.shape_cast %12 : vector<1x8x256xf32> to vector<8x256xf32>
    %c1_16 = arith.constant 1 : index
    %c0_17 = arith.constant 0 : index
    %c768_18 = arith.constant 768 : index
    %14 = vector.load %arg1[%c1_16, %c0_17, %c768_18] : memref<4x8x1024xf32, #tpu.memory_space<vmem>>, vector<1x8x256xf32>
    %15 = vector.shape_cast %14 : vector<1x8x256xf32> to vector<8x256xf32>
    %c2 = arith.constant 2 : index
    %c0_19 = arith.constant 0 : index
    %c0_20 = arith.constant 0 : index
    %16 = vector.load %arg1[%c2, %c0_19, %c0_20] : memref<4x8x1024xf32, #tpu.memory_space<vmem>>, vector<1x8x256xf32>
    %17 = vector.shape_cast %16 : vector<1x8x256xf32> to vector<8x256xf32>
    %c2_21 = arith.constant 2 : index
    %c0_22 = arith.constant 0 : index
    %c256_23 = arith.constant 256 : index
    %18 = vector.load %arg1[%c2_21, %c0_22, %c256_23] : memref<4x8x1024xf32, #tpu.memory_space<vmem>>, vector<1x8x256xf32>
    %19 = vector.shape_cast %18 : vector<1x8x256xf32> to vector<8x256xf32>
    %c2_24 = arith.constant 2 : index
    %c0_25 = arith.constant 0 : index
    %c512_26 = arith.constant 512 : index
    %20 = vector.load %arg1[%c2_24, %c0_25, %c512_26] : memref<4x8x1024xf32, #tpu.memory_space<vmem>>, vector<1x8x256xf32>
    %21 = vector.shape_cast %20 : vector<1x8x256xf32> to vector<8x256xf32>
    %c2_27 = arith.constant 2 : index
    %c0_28 = arith.constant 0 : index
    %c768_29 = arith.constant 768 : index
    %22 = vector.load %arg1[%c2_27, %c0_28, %c768_29] : memref<4x8x1024xf32, #tpu.memory_space<vmem>>, vector<1x8x256xf32>
    %23 = vector.shape_cast %22 : vector<1x8x256xf32> to vector<8x256xf32>
    %c3 = arith.constant 3 : index
    %c0_30 = arith.constant 0 : index
    %c0_31 = arith.constant 0 : index
    %24 = vector.load %arg1[%c3, %c0_30, %c0_31] : memref<4x8x1024xf32, #tpu.memory_space<vmem>>, vector<1x8x256xf32>
    %25 = vector.shape_cast %24 : vector<1x8x256xf32> to vector<8x256xf32>
    %c3_32 = arith.constant 3 : index
    %c0_33 = arith.constant 0 : index
    %c256_34 = arith.constant 256 : index
    %26 = vector.load %arg1[%c3_32, %c0_33, %c256_34] : memref<4x8x1024xf32, #tpu.memory_space<vmem>>, vector<1x8x256xf32>
    %27 = vector.shape_cast %26 : vector<1x8x256xf32> to vector<8x256xf32>
    %c3_35 = arith.constant 3 : index
    %c0_36 = arith.constant 0 : index
    %c512_37 = arith.constant 512 : index
    %28 = vector.load %arg1[%c3_35, %c0_36, %c512_37] : memref<4x8x1024xf32, #tpu.memory_space<vmem>>, vector<1x8x256xf32>
    %29 = vector.shape_cast %28 : vector<1x8x256xf32> to vector<8x256xf32>
    %c3_38 = arith.constant 3 : index
    %c0_39 = arith.constant 0 : index
    %c768_40 = arith.constant 768 : index
    %30 = vector.load %arg1[%c3_38, %c0_39, %c768_40] : memref<4x8x1024xf32, #tpu.memory_space<vmem>>, vector<1x8x256xf32>
    %31 = vector.shape_cast %30 : vector<1x8x256xf32> to vector<8x256xf32>
    %c0_41 = arith.constant 0 : index
    %c0_42 = arith.constant 0 : index
    %32 = vector.load %arg0[%c0_41, %c0_42] : memref<16x1024xf32, #tpu.memory_space<vmem>>, vector<8x256xf32>
    %c0_43 = arith.constant 0 : index
    %c256_44 = arith.constant 256 : index
    %33 = vector.load %arg0[%c0_43, %c256_44] : memref<16x1024xf32, #tpu.memory_space<vmem>>, vector<8x256xf32>
    %c0_45 = arith.constant 0 : index
    %c512_46 = arith.constant 512 : index
    %34 = vector.load %arg0[%c0_45, %c512_46] : memref<16x1024xf32, #tpu.memory_space<vmem>>, vector<8x256xf32>
    %c0_47 = arith.constant 0 : index
    %c768_48 = arith.constant 768 : index
    %35 = vector.load %arg0[%c0_47, %c768_48] : memref<16x1024xf32, #tpu.memory_space<vmem>>, vector<8x256xf32>
    %36 = arith.mulf %32, %1 : vector<8x256xf32>
    %37 = arith.mulf %33, %3 : vector<8x256xf32>
    %38 = arith.addf %36, %37 : vector<8x256xf32>
    %39 = arith.mulf %34, %5 : vector<8x256xf32>
    %40 = arith.addf %38, %39 : vector<8x256xf32>
    %41 = arith.mulf %35, %7 : vector<8x256xf32>
    %42 = arith.addf %40, %41 : vector<8x256xf32>
    %43 = arith.mulf %32, %9 : vector<8x256xf32>
    %44 = arith.mulf %33, %11 : vector<8x256xf32>
    %45 = arith.addf %43, %44 : vector<8x256xf32>
    %46 = arith.mulf %34, %13 : vector<8x256xf32>
    %47 = arith.addf %45, %46 : vector<8x256xf32>
    %48 = arith.mulf %35, %15 : vector<8x256xf32>
    %49 = arith.addf %47, %48 : vector<8x256xf32>
    %50 = arith.mulf %32, %17 : vector<8x256xf32>
    %51 = arith.mulf %33, %19 : vector<8x256xf32>
    %52 = arith.addf %50, %51 : vector<8x256xf32>
    %53 = arith.mulf %34, %21 : vector<8x256xf32>
    %54 = arith.addf %52, %53 : vector<8x256xf32>
    %55 = arith.mulf %35, %23 : vector<8x256xf32>
    %56 = arith.addf %54, %55 : vector<8x256xf32>
    %57 = arith.mulf %32, %25 : vector<8x256xf32>
    %58 = arith.mulf %33, %27 : vector<8x256xf32>
    %59 = arith.addf %57, %58 : vector<8x256xf32>
    %60 = arith.mulf %34, %29 : vector<8x256xf32>
    %61 = arith.addf %59, %60 : vector<8x256xf32>
    %62 = arith.mulf %35, %31 : vector<8x256xf32>
    %63 = arith.addf %61, %62 : vector<8x256xf32>
    %c0_49 = arith.constant 0 : index
    %c0_50 = arith.constant 0 : index
    %64 = vector.load %arg2[%c0_49, %c0_50] : memref<16x256xf32, #tpu.memory_space<vmem>>, vector<8x256xf32>
    %65 = arith.mulf %64, %42 : vector<8x256xf32>
    %66 = arith.addf %65, %49 : vector<8x256xf32>
    %c0_51 = arith.constant 0 : index
    %c0_52 = arith.constant 0 : index
    %67 = vector.load %arg4[%c0_51, %c0_52] : memref<16x256xf32, #tpu.memory_space<vmem>>, vector<8x256xf32>
    tpu.vector_store %arg4[%c0_51, %c0_52], %66 {strides = array<i32>} : memref<16x256xf32, #tpu.memory_space<vmem>>, vector<8x256xf32>,
    %c0_53 = arith.constant 0 : index
    %c0_54 = arith.constant 0 : index
    %68 = vector.load %arg3[%c0_53, %c0_54] : memref<16x256xf32, #tpu.memory_space<vmem>>, vector<8x256xf32>
    %69 = arith.mulf %68, %56 : vector<8x256xf32>
    %70 = arith.addf %69, %63 : vector<8x256xf32>
    %71 = math.exp %70 : vector<8x256xf32>
    %c0_55 = arith.constant 0 : index
    %c0_56 = arith.constant 0 : index
    %72 = vector.load %arg5[%c0_55, %c0_56] : memref<16x256xf32, #tpu.memory_space<vmem>>, vector<8x256xf32>
    tpu.vector_store %arg5[%c0_55, %c0_56], %71 {strides = array<i32>} : memref<16x256xf32, #tpu.memory_space<vmem>>, vector<8x256xf32>,
    %c8 = arith.constant 8 : index
    %c0_57 = arith.constant 0 : index
    %73 = vector.load %arg0[%c8, %c0_57] : memref<16x1024xf32, #tpu.memory_space<vmem>>, vector<8x256xf32>
    %c8_58 = arith.constant 8 : index
    %c256_59 = arith.constant 256 : index
    %74 = vector.load %arg0[%c8_58, %c256_59] : memref<16x1024xf32, #tpu.memory_space<vmem>>, vector<8x256xf32>
    %c8_60 = arith.constant 8 : index
    %c512_61 = arith.constant 512 : index
    %75 = vector.load %arg0[%c8_60, %c512_61] : memref<16x1024xf32, #tpu.memory_space<vmem>>, vector<8x256xf32>
    %c8_62 = arith.constant 8 : index
    %c768_63 = arith.constant 768 : index
    %76 = vector.load %arg0[%c8_62, %c768_63] : memref<16x1024xf32, #tpu.memory_space<vmem>>, vector<8x256xf32>
    %77 = arith.mulf %73, %1 : vector<8x256xf32>
    %78 = arith.mulf %74, %3 : vector<8x256xf32>
    %79 = arith.addf %77, %78 : vector<8x256xf32>
    %80 = arith.mulf %75, %5 : vector<8x256xf32>
    %81 = arith.addf %79, %80 : vector<8x256xf32>
    %82 = arith.mulf %76, %7 : vector<8x256xf32>
    %83 = arith.addf %81, %82 : vector<8x256xf32>
    %84 = arith.mulf %73, %9 : vector<8x256xf32>
    %85 = arith.mulf %74, %11 : vector<8x256xf32>
    %86 = arith.addf %84, %85 : vector<8x256xf32>
    %87 = arith.mulf %75, %13 : vector<8x256xf32>
    %88 = arith.addf %86, %87 : vector<8x256xf32>
    %89 = arith.mulf %76, %15 : vector<8x256xf32>
    %90 = arith.addf %88, %89 : vector<8x256xf32>
    %91 = arith.mulf %73, %17 : vector<8x256xf32>
    %92 = arith.mulf %74, %19 : vector<8x256xf32>
    %93 = arith.addf %91, %92 : vector<8x256xf32>
    %94 = arith.mulf %75, %21 : vector<8x256xf32>
    %95 = arith.addf %93, %94 : vector<8x256xf32>
    %96 = arith.mulf %76, %23 : vector<8x256xf32>
    %97 = arith.addf %95, %96 : vector<8x256xf32>
    %98 = arith.mulf %73, %25 : vector<8x256xf32>
    %99 = arith.mulf %74, %27 : vector<8x256xf32>
    %100 = arith.addf %98, %99 : vector<8x256xf32>
    %101 = arith.mulf %75, %29 : vector<8x256xf32>
    %102 = arith.addf %100, %101 : vector<8x256xf32>
    %103 = arith.mulf %76, %31 : vector<8x256xf32>
    %104 = arith.addf %102, %103 : vector<8x256xf32>
    %c8_64 = arith.constant 8 : index
    %c0_65 = arith.constant 0 : index
    %105 = vector.load %arg2[%c8_64, %c0_65] : memref<16x256xf32, #tpu.memory_space<vmem>>, vector<8x256xf32>
    %106 = arith.mulf %105, %83 : vector<8x256xf32>
    %107 = arith.addf %106, %90 : vector<8x256xf32>
    %c8_66 = arith.constant 8 : index
    %c0_67 = arith.constant 0 : index
    %108 = vector.load %arg4[%c8_66, %c0_67] : memref<16x256xf32, #tpu.memory_space<vmem>>, vector<8x256xf32>
    tpu.vector_store %arg4[%c8_66, %c0_67], %107 {strides = array<i32>} : memref<16x256xf32, #tpu.memory_space<vmem>>, vector<8x256xf32>,
    %c8_68 = arith.constant 8 : index
    %c0_69 = arith.constant 0 : index
    %109 = vector.load %arg3[%c8_68, %c0_69] : memref<16x256xf32, #tpu.memory_space<vmem>>, vector<8x256xf32>
    %110 = arith.mulf %109, %97 : vector<8x256xf32>
    %111 = arith.addf %110, %104 : vector<8x256xf32>
    %112 = math.exp %111 : vector<8x256xf32>
    %c8_70 = arith.constant 8 : index
    %c0_71 = arith.constant 0 : index
    %113 = vector.load %arg5[%c8_70, %c0_71] : memref<16x256xf32, #tpu.memory_space<vmem>>, vector<8x256xf32>
    tpu.vector_store %arg5[%c8_70, %c0_71], %112 {strides = array<i32>} : memref<16x256xf32, #tpu.memory_space<vmem>>, vector<8x256xf32>,
    return
  }
}

</mosaic_0001>

<bundles_post_ra>
// kernel: spatiotemporal_emos_forward.1
= control target key start
LH: loop header
LB: loop body
LE: loop exit
PB: predicated region body
PF: predicated region fallthrough
CT: control target
= control target key end

     0   :  { %s612_s1 = inlined_call_operand.vmem [shape: f32[4,8,1024], index: 1, kind: input, shape index: {}]   ;;  %s613_s0 = inlined_call_operand.vmem [shape: f32[16,1024], index: 0, kind: input, shape index: {}]   ;;  %s614_s2 = inlined_call_operand.vmem [shape: f32[16,256], index: 2, kind: input, shape index: {}]   ;;  %s615_s3 = inlined_call_operand.vmem [shape: f32[16,256], index: 3, kind: input, shape index: {}]   ;;  %s616_s4 = inlined_call_operand.vmem [shape: f32[16,256], index: 4, kind: output, shape index: {0}]   ;;  %s617_s5 = inlined_call_operand.vmem [shape: f32[16,256], index: 5, kind: output, shape index: {1}]  }
   0x1   :  { %v295_v0 = vld [vmem:[%s612_s1] sm:$0xff]  ;;  %v300_v1 = vld [vmem:[%s612_s1 + $0x10] sm:$0xff]  ;;  %v404_v37 = vld [vmem:[%s612_s1 + $0x8] sm:$0xff] }
   0x2   :  { %v305_v2 = vld [vmem:[%s612_s1 + $0x20] sm:$0xff]  ;;  %v310_v3 = vld [vmem:[%s612_s1 + $0x30] sm:$0xff]  ;;  %v409_v38 = vld [vmem:[%s612_s1 + $0x18] sm:$0xff] }
   0x3   :  { %v315_v4 = vld [vmem:[%s612_s1 + $0x40] sm:$0xff]  ;;  %v320_v5 = vld [vmem:[%s612_s1 + $0x50] sm:$0xff]  ;;  %v415_v43 = vld [vmem:[%s612_s1 + $0x28] sm:$0xff] }
   0x4   :  { %v325_v6 = vld [vmem:[%s612_s1 + $0x60] sm:$0xff]  ;;  %v330_v7 = vld [vmem:[%s612_s1 + $0x70] sm:$0xff]  ;;  %v420_v44 = vld [vmem:[%s612_s1 + $0x38] sm:$0xff] }
   0x5   :  { %v335_v8 = vld [vmem:[%s612_s1 + $0x80] sm:$0xff]  ;;  %v340_v9 = vld [vmem:[%s612_s1 + $0x90] sm:$0xff]  ;;  %v425_v45 = vld [vmem:[%s612_s1 + $0x48] sm:$0xff] }
   0x6   :  { %v345_v10 = vld [vmem:[%s612_s1 + $0xa0] sm:$0xff]  ;;  %v350_v11 = vld [vmem:[%s612_s1 + $0xb0] sm:$0xff]  ;;  %v431_v48 = vld [vmem:[%s612_s1 + $0x58] sm:$0xff] }
   0x7   :  { %v355_v12 = vld [vmem:[%s612_s1 + $0xc0] sm:$0xff]  ;;  %v56_v14 = vld [vmem:[%s613_s0 + $0x10] sm:$0xff]  ;;  %v436_v49 = vld [vmem:[%s612_s1 + $0x68] sm:$0xff] }
   0x8   :  { %v54_v13 = vld [vmem:[%s613_s0] sm:$0xff]  ;;  %v366_v15 = vld [vmem:[%s612_s1 + $0xd0] sm:$0xff]  ;;  %v64_v19 = vmul.f32 %v56_v14, %v300_v1  ;;  %v78_v21 = vmul.f32 %v320_v5, %v56_v14  ;;  %v92_v31 = vmul.f32 %v340_v9, %v56_v14  ;;  %v441_v50 = vld [vmem:[%s612_s1 + $0x78] sm:$0xff] }
   0x9   :  { %v58_v16 = vld [vmem:[%s613_s0 + $0x20] sm:$0xff]  ;;  %v60_v17 = vld [vmem:[%s613_s0 + $0x30] sm:$0xff]  ;;  %v62_v18 = vmul.f32 %v54_v13, %v295_v0  ;;  %v76_v20 = vmul.f32 %v315_v4, %v54_v13  ;;  %v90_v30 = vmul.f32 %v335_v8, %v54_v13  ;;  %v104_v34 = vmul.f32 %v355_v12, %v54_v13  ;;  %v446_v54 = vld [vmem:[%s612_s1 + $0x88] sm:$0xff] }
   0xa   :  { %v381_v22 = vld [vmem:[%s612_s1 + $0xe0] sm:$0xff]  ;;  %v68_v23 = vmul.f32 %v58_v16, %v305_v2  ;;  %v72_v24 = vmul.f32 %v60_v17, %v310_v3  ;;  %v82_v25 = vmul.f32 %v325_v6, %v58_v16  ;;  %v86_v26 = vmul.f32 %v330_v7, %v60_v17  ;;  %v390_v27 = vld [vmem:[%s612_s1 + $0xf0] sm:$0xff]  ;;  %v55_v55 = vld [vmem:[%s613_s0 + $0x8] sm:$0xff] }
   0xb   :  { %v66_v28 = vadd.f32 %v64_v19, %v62_v18  ;;  %v80_v29 = vadd.f32 %v78_v21, %v76_v20  ;;  %v96_v32 = vmul.f32 %v345_v10, %v58_v16  ;;  %v100_v33 = vmul.f32 %v350_v11, %v60_v17  ;;  %v118_v36 = vld [vmem:[%s614_s2] sm:$0xff]  ;;  %v57_v56 = vld [vmem:[%s613_s0 + $0x18] sm:$0xff]  ;;  %v59_v59 = vld [vmem:[%s613_s0 + $0x28] sm:$0xff] }
   0xc   :  { %v106_v35 = vmul.f32 %v366_v15, %v56_v14  ;;  %v94_v41 = vadd.f32 %v92_v31, %v90_v30  ;;  %v110_v42 = vmul.f32 %v381_v22, %v58_v16  ;;  %v114_v47 = vmul.f32 %v390_v27, %v60_v17  ;;  %v457_v58 = vld [vmem:[%s612_s1 + $0x98] sm:$0xff]  ;;  %v471_v16 = vld [vmem:[%s612_s1 + $0xa8] sm:$0xff] }
   0xd   :  { %v70_v39 = vadd.f32 %v68_v23, %v66_v28  ;;  %v84_v40 = vadd.f32 %v82_v25, %v80_v29  ;;  %v61_v60 = vld [vmem:[%s613_s0 + $0x38] sm:$0xff]  ;;  %v63_v61 = vmul.f32 %v55_v55, %v404_v37  ;;  %v65_v62 = vmul.f32 %v57_v56, %v409_v38  ;;  %v483_v21 = vld [vmem:[%s612_s1 + $0xc8] sm:$0xff] }
   0xe   :  { %v108_v46 = vadd.f32 %v106_v35, %v104_v34  ;;  %v98_v53 = vadd.f32 %v96_v32, %v94_v41  ;;  %v77_v63 = vmul.f32 %v425_v45, %v55_v55  ;;  %v476_v17 = vld [vmem:[%s612_s1 + $0xb8] sm:$0xff]  ;;  %v69_v18 = vmul.f32 %v59_v59, %v415_v43  ;;  %v126_v34 = vld [vmem:[%s615_s3] sm:$0xff] }
   0xf   :  { %v74_v51 = vadd.f32 %v72_v24, %v70_v39  ;;  %v88_v52 = vadd.f32 %v86_v26, %v84_v40  ;;  %v73_v19 = vmul.f32 %v61_v60, %v420_v44  ;;  %v488_v23 = vld [vmem:[%s612_s1 + $0xd8] sm:$0xff]  ;;  %v493_v24 = vld [vmem:[%s612_s1 + $0xe8] sm:$0xff]  ;;  %v67_v25 = vadd.f32 %v65_v62, %v63_v61  ;;  %v138_v62 = vld [vmem:[%s613_s0 + $0x40] sm:$0xff] }
  0x10   :  { %v112_v57 = vadd.f32 %v110_v42, %v108_v46  ;;  %v102_v13 = vadd.f32 %v100_v33, %v98_v53  ;;  %v79_v26 = vmul.f32 %v431_v48, %v57_v56  ;;  %v83_v28 = vmul.f32 %v436_v49, %v59_v59  ;;  %v500_v30 = vld [vmem:[%s612_s1 + $0xf8] sm:$0xff] }
  0x11   :  { %v120_v14 = vmul.f32 %v118_v36, %v74_v51  ;;  %v87_v31 = vmul.f32 %v441_v50, %v61_v60  ;;  %v91_v32 = vmul.f32 %v446_v54, %v55_v55  ;;  %v93_v33 = vmul.f32 %v457_v58, %v57_v56  ;;  %v119_v51 = vld [vmem:[%s614_s2 + $0x8] sm:$0xff] }
  0x12   :  { %v116_v20 = vadd.f32 %v114_v47, %v112_v57  ;;  %v71_v35 = vadd.f32 %v69_v18, %v67_v25  ;;  %v81_v36 = vadd.f32 %v79_v26, %v77_v63  ;;  %v97_v39 = vmul.f32 %v471_v16, %v59_v59  ;;  %v127_v25 = vld [vmem:[%s615_s3 + $0x8] sm:$0xff]  ;;  %v144_v26 = vld [vmem:[%s613_s0 + $0x70] sm:$0xff] }
  0x13   :  { %v122_v29 = vadd.f32 %v120_v14, %v88_v52  ;;  %v101_v40 = vmul.f32 %v476_v17, %v61_v60  ;;  %v95_v41 = vadd.f32 %v93_v33, %v91_v32  ;;  %v105_v42 = vmul.f32 %v483_v21, %v55_v55  ;;  %v140_v55 = vld [vmem:[%s613_s0 + $0x50] sm:$0xff] }
  0x14   :  { %v107_v46 = vmul.f32 %v488_v23, %v57_v56  ;;  %v111_v47 = vmul.f32 %v493_v24, %v59_v59  ;;  %v75_v52 = vadd.f32 %v73_v19, %v71_v35  ;;  %v85_v53 = vadd.f32 %v83_v28, %v81_v36  ;;  %v142_v59 = vld [vmem:[%s613_s0 + $0x60] sm:$0xff] }
  0x15   :  { %124 = vst [vmem:[%s616_s4] sm:$0xff] %v122_v29  ;;  %v115_v57 = vmul.f32 %v500_v30, %v61_v60  ;;  %v128_v61 = vmul.f32 %v126_v34, %v102_v13  ;;  %v99_v56 = vadd.f32 %v97_v39, %v95_v41  ;;  %v146_v14 = vmul.f32 %v138_v62, %v295_v0 }
  0x16   :  { %v109_v63 = vadd.f32 %v107_v46, %v105_v42  ;;  %v148_v18 = vmul.f32 %v140_v55, %v300_v1  ;;  %v89_v60 = vadd.f32 %v87_v31, %v85_v53  ;;  %v121_v13 = vmul.f32 %v119_v51, %v75_v52 }
  0x17   :  { %v130_v19 = vadd.f32 %v128_v61, %v116_v20  ;;  %v152_v28 = vmul.f32 %v142_v59, %v305_v2  ;;  %v103_v29 = vadd.f32 %v101_v40, %v99_v56  ;;  %v156_v0 = vmul.f32 %v144_v26, %v310_v3 }
  0x18   :  { %v113_v32 = vadd.f32 %v111_v47, %v109_v63  ;;  %v150_v33 = vadd.f32 %v148_v18, %v146_v14  ;;  %v123_v34 = vadd.f32 %v121_v13, %v89_v60  ;;  %v160_v31 = vmul.f32 %v315_v4, %v138_v62 }
  0x19   :  { %v132_v1 = vmul.f32 1.442695, %v130_v19  ;;  %v162_v20 = vmul.f32 %v320_v5, %v140_v55  ;;  %v129_v36 = vmul.f32 %v127_v25, %v103_v29  ;;  %v166_v41 = vmul.f32 %v325_v6, %v142_v59  ;;  %v202_v6 = vld [vmem:[%s614_s2 + $0x10] sm:$0xff] }
  0x1a   :  { %v117_v35 = vadd.f32 %v115_v57, %v113_v32  ;;  %v154_v39 = vadd.f32 %v152_v28, %v150_v33  ;;  %125 = vst [vmem:[%s616_s4 + $0x8] sm:$0xff] %v123_v34  ;;  %v170_v40 = vmul.f32 %v330_v7, %v144_v26  ;;  %v174_v3 = vmul.f32 %v335_v8, %v138_v62 }
  0x1b   :  { %254 = vpow2.f32 %v132_v1  ;;  %v164_v2 = vadd.f32 %v162_v20, %v160_v31  ;;  %v176_v4 = vmul.f32 %v340_v9, %v140_v55  ;;  %v180_v5 = vmul.f32 %v345_v10, %v142_v59  ;;  %v139_v9 = vld [vmem:[%s613_s0 + $0x48] sm:$0xff] }
  0x1c   :  { %v131_v42 = vadd.f32 %v129_v36, %v117_v35  ;;  %v158_v46 = vadd.f32 %v156_v0, %v154_v39  ;;  %v184_v51 = vmul.f32 %v350_v11, %v144_v26  ;;  %v188_v52 = vmul.f32 %v355_v12, %v138_v62  ;;  %v141_v11 = vld [vmem:[%s613_s0 + $0x58] sm:$0xff]  ;;  %v143_v12 = vld [vmem:[%s613_s0 + $0x68] sm:$0xff] }
  0x1d   :  { %v168_v47 = vadd.f32 %v166_v41, %v164_v2  ;;  %v190_v53 = vmul.f32 %v366_v15, %v140_v55  ;;  %v178_v57 = vadd.f32 %v176_v4, %v174_v3  ;;  %v194_v8 = vmul.f32 %v381_v22, %v142_v59 }
  0x1e   :  { %v134_v7 = vmul.f32 1.442695, %v131_v42  ;;  %v198_v61 = vmul.f32 %v390_v27, %v144_v26  ;;  %v204_v63 = vmul.f32 %v202_v6, %v158_v46  ;;  %v147_v15 = vmul.f32 %v139_v9, %v404_v37  ;;  %v145_v27 = vld [vmem:[%s613_s0 + $0x78] sm:$0xff] }
  0x1f   :  { %v172_v10 = vadd.f32 %v170_v40, %v168_v47  ;;  %v192_v56 = vadd.f32 %v190_v53, %v188_v52  ;;  %v182_v22 = vadd.f32 %v180_v5, %v178_v57  ;;  %v149_v62 = vmul.f32 %v141_v11, %v409_v38 }
  0x20   :  { %256 = vpow2.f32 %v134_v7  ;;  %v153_v55 = vmul.f32 %v143_v12, %v415_v43  ;;  %v157_v18 = vmul.f32 %v145_v27, %v420_v44  ;;  %v161_v60 = vmul.f32 %v425_v45, %v139_v9  ;;  %v210_v44 = vld [vmem:[%s615_s3 + $0x10] sm:$0xff] }
  0x21   :  { %v196_v59 = vadd.f32 %v194_v8, %v192_v56  ;;  %v206_v14 = vadd.f32 %v204_v63, %v172_v10  ;;  %v186_v13 = vadd.f32 %v184_v51, %v182_v22  ;;  %v151_v19 = vadd.f32 %v149_v62, %v147_v15 }
  0x22   :  { %v163_v37 = vmul.f32 %v431_v48, %v141_v11  ;;  %v167_v25 = vmul.f32 %v436_v49, %v143_v12  ;;  %v171_v38 = vmul.f32 %v441_v50, %v145_v27  ;;  %v175_v43 = vmul.f32 %v446_v54, %v139_v9  ;;  %v203_v54 = vld [vmem:[%s614_s2 + $0x18] sm:$0xff] }
  0x23   :  { %v200_v26 = vadd.f32 %v198_v61, %v196_v59  ;;  %208 = vst [vmem:[%s616_s4 + $0x10] sm:$0xff] %v206_v14  ;;  %v177_v28 = vmul.f32 %v457_v58, %v141_v11  ;;  %v155_v45 = vadd.f32 %v153_v55, %v151_v19  ;;  %v181_v48 = vmul.f32 %v471_v16, %v143_v12 }
  0x24   :  { %v165_v29 = vadd.f32 %v163_v37, %v161_v60  ;;  %v185_v49 = vmul.f32 %v476_v17, %v145_v27  ;;  %v189_v33 = vmul.f32 %v483_v21, %v139_v9  ;;  %v191_v0 = vmul.f32 %v488_v23, %v141_v11  ;;  %v211_v21 = vld [vmem:[%s615_s3 + $0x18] sm:$0xff] }
  0x25   :  { %v179_v32 = vadd.f32 %v177_v28, %v175_v43  ;;  %v195_v50 = vmul.f32 %v493_v24, %v143_v12  ;;  %v159_v58 = vadd.f32 %v157_v18, %v155_v45  ;;  %v212_v1 = vmul.f32 %v210_v44, %v186_v13 }
  0x26   :  { %v169_v34 = vadd.f32 %v167_v25, %v165_v29  ;;  %v193_v20 = vadd.f32 %v191_v0, %v189_v33  ;;  %v199_v16 = vmul.f32 %v500_v30, %v145_v27 }
  0x27   :  { %v183_v31 = vadd.f32 %v181_v48, %v179_v32  ;;  %v205_v36 = vmul.f32 %v203_v54, %v159_v58  ;;  %v214_v39 = vadd.f32 %v212_v1, %v200_v26 }
  0x28   :  { %v255_v35 = vpop.eup %254  ;;  %v173_v17 = vadd.f32 %v171_v38, %v169_v34  ;;  %v197_v24 = vadd.f32 %v195_v50, %v193_v20 }
  0x29   :  { %136 = vst [vmem:[%s617_s5] sm:$0xff] %v255_v35  ;;  %v187_v23 = vadd.f32 %v185_v49, %v183_v31  ;;  %v216_v2 = vmul.f32 1.442695, %v214_v39 }
  0x2a   :  { %v207_v41 = vadd.f32 %v205_v36, %v173_v17  ;;  %v201_v40 = vadd.f32 %v199_v16, %v197_v24 }
  0x2b   :  { %v213_v3 = vmul.f32 %v211_v21, %v187_v23  ;;  %258 = vpow2.f32 %v216_v2 }
  0x2c   :  { %209 = vst [vmem:[%s616_s4 + $0x18] sm:$0xff] %v207_v41 }
  0x2d   :  { %v257_v30 = vpop.eup %256  ;;  %v215_v42 = vadd.f32 %v213_v3, %v201_v40 }
  0x2e   :  { %137 = vst [vmem:[%s617_s5 + $0x8] sm:$0xff] %v257_v30 }
  0x2f   :  { %v218_v46 = vmul.f32 1.442695, %v215_v42 }
  0x31   :  { %260 = vpow2.f32 %v218_v46 }
  0x38   :  { %v259_v4 = vpop.eup %258 }
  0x39   :  { %220 = vst [vmem:[%s617_s5 + $0x10] sm:$0xff] %v259_v4 }
  0x3e   :  { %v261_v5 = vpop.eup %260 }
  0x3f   :  { %221 = vst [vmem:[%s617_s5 + $0x18] sm:$0xff] %v261_v5 }

</bundles_post_ra>
